<compile_context>
chip_gen: v7x
topology: tpu7x:2x2x1
jax: 0.10.0
libtpu: 0.0.40
codegen_flags: <defaults>
</compile_context>

<pallas_src>
import jax
import jax.numpy as jnp
from jax.experimental import pallas as pl
from jax.experimental.pallas import tpu as pltpu


# ----------------------------- helpers ---------------------------------------
def _round_up(x, m):
    return ((x + m - 1) // m) * m


def _cdiv(a, b):
    return (a + b - 1) // b


def _tpu_budget():
    """Returns (row_tile, per-step VMEM budget, vmem_limit cap, min grid steps)."""
    try:
        vmem = pltpu.get_tpu_info().vmem_capacity_bytes
    except Exception:
        vmem = 64 << 20                         # assume smallest (v7x-class) if unknown
    if vmem <= (64 << 20):                      # v7x: 64 MiB VMEM, 2 TensorCores
        return 512, 40 << 20, 48 << 20, 4
    return 1024, 80 << 20, 96 << 20, 1          # v5e / v6e: 128 MiB VMEM, 1 TC


# ----------------------------- Pallas kernels --------------------------------
def _fused_small_kernel(a_ref, x_ref, w1_ref, b1_ref, ws02_ref, ws03_ref,
                        w2_ref, b2_ref, ws13_ref, w3_ref, b3_ref,
                        wl_ref, bl_ref, out_ref):
    """Whole forward pass in VMEM: A is read exactly once. Output: sigmoid [N,1]."""
    a = a_ref[...]                                                # [N, N] bf16
    x = x_ref[...]                                                # [N, F] bf16
    # layer 1: h1 = relu(A @ (X W1) + b1)
    xw1 = jnp.dot(x, w1_ref[...], preferred_element_type=jnp.float32)
    h1 = jnp.maximum(
        jnp.dot(a, xw1.astype(jnp.bfloat16), preferred_element_type=jnp.float32)
        + b1_ref[...], 0.0)                                       # [N, 64] f32
    h1_bf = h1.astype(jnp.bfloat16)
    # layer 2: h2 = relu(A @ (h1 W2) + X Ws02 + b)
    h1w2 = jnp.dot(h1_bf, w2_ref[...], preferred_element_type=jnp.float32)
    skip02 = jnp.dot(x, ws02_ref[...], preferred_element_type=jnp.float32)
    h2 = jnp.maximum(
        jnp.dot(a, h1w2.astype(jnp.bfloat16), preferred_element_type=jnp.float32)
        + skip02 + b2_ref[...], 0.0)                              # [N, 32] f32
    # layer 3: h3 = relu(A @ (h2 W3) + X Ws03 + h1 Ws13 + b)
    h2w3 = jnp.dot(h2.astype(jnp.bfloat16), w3_ref[...],
                   preferred_element_type=jnp.float32)
    skip03 = jnp.dot(x, ws03_ref[...], preferred_element_type=jnp.float32)
    skip13 = jnp.dot(h1_bf, ws13_ref[...], preferred_element_type=jnp.float32)
    h3 = jnp.maximum(
        jnp.dot(a, h2w3.astype(jnp.bfloat16), preferred_element_type=jnp.float32)
        + skip03 + skip13 + b3_ref[...], 0.0)                     # [N, 16] f32
    # head: elementwise mul + lane reduce (no transpose), sigmoid, store [N, 1]
    logits = jnp.sum(h3 * wl_ref[...], axis=-1, keepdims=True) + bl_ref[...]
    out_ref[...] = jax.nn.sigmoid(logits)


def _proj_x_kernel(x_ref, w_ref, xw1_ref, skip02_ref, skip03_ref):
    """XP = X @ [W1 | Ws02 | Ws03]; emit the three pieces directly in bf16."""
    xp = jnp.dot(x_ref[...], w_ref[...], preferred_element_type=jnp.float32)
    xw1_ref[...] = xp[:, 0:64].astype(jnp.bfloat16)
    skip02_ref[...] = xp[:, 64:96].astype(jnp.bfloat16)
    skip03_ref[...] = xp[:, 96:112].astype(jnp.bfloat16)


def _gcn_layer1_kernel(a_ref, xw1_ref, b1_ref, wh1_ref, h1w2_ref, skip13_ref):
    """h1 = relu(A @ (X W1) + b1);  emit h1 @ [W2 | Ws13] as two bf16 outputs."""
    h1 = jnp.maximum(
        jnp.dot(a_ref[...], xw1_ref[...], preferred_element_type=jnp.float32)
        + b1_ref[...], 0.0)                                       # [TM, 64] f32
    h1p = jnp.dot(h1.astype(jnp.bfloat16), wh1_ref[...],
                  preferred_element_type=jnp.float32)             # [TM, 48]
    h1w2_ref[...] = h1p[:, 0:32].astype(jnp.bfloat16)
    skip13_ref[...] = h1p[:, 32:48].astype(jnp.bfloat16)


def _gcn_layer2_kernel(a_ref, h1w2_ref, skip02_ref, b2_ref, w3_ref, h2w3_ref):
    """h2 = relu(A @ (h1 W2) + skip0_2 + b);  emit h2 @ W3 in bf16."""
    h2 = jnp.maximum(
        jnp.dot(a_ref[...], h1w2_ref[...], preferred_element_type=jnp.float32)
        + skip02_ref[...].astype(jnp.float32) + b2_ref[...], 0.0)  # [TM, 32] f32
    h2w3_ref[...] = jnp.dot(h2.astype(jnp.bfloat16), w3_ref[...],
                            preferred_element_type=jnp.float32).astype(jnp.bfloat16)


def _gcn_layer3_head_kernel(a_ref, h2w3_ref, skip03_ref, skip13_ref, b3_ref,
                            wl_ref, bl_ref, out_ref):
    """h3 = relu(A @ (h2 W3) + skips + b);  out = sigmoid(h3 @ wl + bl) as (TM, 1)."""
    h3 = jnp.maximum(
        jnp.dot(a_ref[...], h2w3_ref[...], preferred_element_type=jnp.float32)
        + skip03_ref[...].astype(jnp.float32)
        + skip13_ref[...].astype(jnp.float32) + b3_ref[...], 0.0)  # [TM, 16] f32
    # No transpose: broadcast-mul with wl and reduce over the lane axis.
    logits = jnp.sum(h3 * wl_ref[...], axis=-1, keepdims=True) + bl_ref[...]
    out_ref[...] = jax.nn.sigmoid(logits)                          # [TM, 1]


# ----------------------------- wrapper ---------------------------------------
def dense_gcn3_forward(a_hat, x, params, *, row_tile=None,
                       fused_max_bytes=(20 << 20)):
    """Forward pass of DenseGCN3Layer. Returns sigmoid probabilities [N, 1]."""
    n, f = x.shape
    rt_default, vmem_budget, vmem_cap, min_steps = _tpu_budget()
    if row_tile is None:
        row_tile = rt_default

    # bf16 weights for the MXU, folded biases (built once here; free vs. kernels).
    w1 = params["w1"].astype(jnp.bfloat16)
    ws02 = params["ws02"].astype(jnp.bfloat16)
    ws03 = params["ws03"].astype(jnp.bfloat16)
    w2 = params["w2"].astype(jnp.bfloat16)
    ws13 = params["ws13"].astype(jnp.bfloat16)
    w3 = params["w3"].astype(jnp.bfloat16)
    b1 = params["b1"]                                             # [1, 64]
    b2s = params["b2"] + params["bs02"]                           # [1, 32]
    b3s = params["b3"] + params["bs03"] + params["bs13"]          # [1, 16]
    wl_row = params["wl"].T                                       # [1, 16]
    bl = params["bl"]                                             # [1, 1]

    # ---------- small/medium graphs: single fused call, A read exactly once ----
    n16 = _round_up(n, 16)
    fused_est = 2 * n16 * n16 + 900 * n16 + (1 << 20)
    if fused_est <= fused_max_bytes:
        a_bf = jnp.pad(a_hat, ((0, n16 - n), (0, n16 - n))).astype(jnp.bfloat16)
        x_bf = jnp.pad(x, ((0, n16 - n), (0, 0))).astype(jnp.bfloat16)
        out = pl.pallas_call(
            _fused_small_kernel,
            out_shape=jax.ShapeDtypeStruct((n16, 1), jnp.float32),
            compiler_params=pltpu.CompilerParams(
                vmem_limit_bytes=int(min(max(2 * fused_est, 32 << 20), vmem_cap))),
        )(a_bf, x_bf, w1, b1, ws02, ws03, w2, b2s, ws13, w3, b3s, wl_row, bl)
        return out[:n]

    # ---------- large graphs: row-tiled A stream, 4 pipelined pallas_calls -----
    n_cols = _round_up(n, 128)                   # contraction dim (lane aligned only)

    def tile_bytes(tm_):
        return (2 * tm_ * n_cols * 2             # double-buffered A row tile (bf16)
                + 2 * n_cols * 64 * 2            # largest resident right operand (bf16)
                + 4 * tm_ * 112 * 4              # row-tiled in/out tiles (generous)
                + (2 << 20))                     # weights / biases / compiler scratch

    tm = max(128, row_tile)
    while tm > 128 and (_cdiv(n, tm) < min_steps or tile_bytes(tm) > vmem_budget):
        tm //= 2

    n_rows = _round_up(n, tm)                    # only the ROW dim is tile-padded
    grid = (n_rows // tm,)

    a_bf = jnp.pad(a_hat, ((0, n_rows - n), (0, n_cols - n))).astype(jnp.bfloat16)
    x_bf = jnp.pad(x, ((0, n_rows - n), (0, 0))).astype(jnp.bfloat16)
    w_x = jnp.concatenate([params["w1"], params["ws02"], params["ws03"]],
                          axis=1).astype(jnp.bfloat16)            # [F, 112]
    w_h1 = jnp.concatenate([params["w2"], params["ws13"]],
                           axis=1).astype(jnp.bfloat16)           # [64, 48]

    cparams = pltpu.CompilerParams(
        dimension_semantics=("parallel",),       # split row axis across v7x's 2 TCs
        vmem_limit_bytes=int(min(max(tile_bytes(tm) + (4 << 20), 32 << 20), vmem_cap)))
    a_bytes = n_rows * n_cols * 2

    # --- 1) fused input projection: [XW1 | skip0_2 | skip0_3] in bf16 --------
    xw1, skip02, skip03 = pl.pallas_call(
        _proj_x_kernel,
        out_shape=(jax.ShapeDtypeStruct((n_rows, 64), jnp.bfloat16),
                   jax.ShapeDtypeStruct((n_rows, 32), jnp.bfloat16),
                   jax.ShapeDtypeStruct((n_rows, 16), jnp.bfloat16)),
        grid=grid,
        in_specs=[pl.BlockSpec((tm, f), lambda i: (i, 0)),
                  pl.BlockSpec((f, 112), lambda i: (0, 0))],
        out_specs=(pl.BlockSpec((tm, 64), lambda i: (i, 0)),
                   pl.BlockSpec((tm, 32), lambda i: (i, 0)),
                   pl.BlockSpec((tm, 16), lambda i: (i, 0))),
        compiler_params=cparams,
        cost_estimate=pl.CostEstimate(
            flops=2 * n_rows * f * 112, transcendentals=0,
            bytes_accessed=n_rows * f * 2 + n_rows * 112 * 2),
    )(x_bf, w_x)

    # --- 2) layer 1: h1 = relu(A @ XW1 + b1); emit [h1 W2 | h1 Ws13] bf16 ----
    h1w2, skip13 = pl.pallas_call(
        _gcn_layer1_kernel,
        out_shape=(jax.ShapeDtypeStruct((n_rows, 32), jnp.bfloat16),
                   jax.ShapeDtypeStruct((n_rows, 16), jnp.bfloat16)),
        grid=grid,
        in_specs=[pl.BlockSpec((tm, n_cols), lambda i: (i, 0)),   # A row tile
                  pl.BlockSpec((n_cols, 64), lambda i: (0, 0)),   # XW1 (first n_cols rows)
                  pl.BlockSpec((1, 64), lambda i: (0, 0)),        # b1
                  pl.BlockSpec((64, 48), lambda i: (0, 0))],      # [W2 | Ws13]
        out_specs=(pl.BlockSpec((tm, 32), lambda i: (i, 0)),
                   pl.BlockSpec((tm, 16), lambda i: (i, 0))),
        compiler_params=cparams,
        cost_estimate=pl.CostEstimate(
            flops=2 * n_rows * n_cols * 64 + 2 * n_rows * 64 * 48,
            transcendentals=0,
            bytes_accessed=a_bytes + n_cols * 64 * 2 + n_rows * 48 * 2),
    )(a_bf, xw1, b1, w_h1)

    # --- 3) layer 2: h2 = relu(A @ H1W2 + skip0_2 + b); emit h2 W3 bf16 ------
    h2w3 = pl.pallas_call(
        _gcn_layer2_kernel,
        out_shape=jax.ShapeDtypeStruct((n_rows, 16), jnp.bfloat16),
        grid=grid,
        in_specs=[pl.BlockSpec((tm, n_cols), lambda i: (i, 0)),
                  pl.BlockSpec((n_cols, 32), lambda i: (0, 0)),
                  pl.BlockSpec((tm, 32), lambda i: (i, 0)),
                  pl.BlockSpec((1, 32), lambda i: (0, 0)),
                  pl.BlockSpec((32, 16), lambda i: (0, 0))],
        out_specs=pl.BlockSpec((tm, 16), lambda i: (i, 0)),
        compiler_params=cparams,
        cost_estimate=pl.CostEstimate(
            flops=2 * n_rows * n_cols * 32 + 2 * n_rows * 32 * 16,
            transcendentals=0,
            bytes_accessed=a_bytes + n_cols * 32 * 2 + n_rows * (32 + 16) * 2),
    )(a_bf, h1w2, skip02, b2s, w3)

    # --- 4) layer 3 + sigmoid head -> probabilities (n_rows, 1) --------------
    probs = pl.pallas_call(
        _gcn_layer3_head_kernel,
        out_shape=jax.ShapeDtypeStruct((n_rows, 1), jnp.float32),
        grid=grid,
        in_specs=[pl.BlockSpec((tm, n_cols), lambda i: (i, 0)),
                  pl.BlockSpec((n_cols, 16), lambda i: (0, 0)),
                  pl.BlockSpec((tm, 16), lambda i: (i, 0)),
                  pl.BlockSpec((tm, 16), lambda i: (i, 0)),
                  pl.BlockSpec((1, 16), lambda i: (0, 0)),
                  pl.BlockSpec((1, 16), lambda i: (0, 0)),
                  pl.BlockSpec((1, 1), lambda i: (0, 0))],
        out_specs=pl.BlockSpec((tm, 1), lambda i: (i, 0)),
        compiler_params=cparams,
        cost_estimate=pl.CostEstimate(
            flops=2 * n_rows * n_cols * 16 + 2 * n_rows * 16,
            transcendentals=n_rows,
            bytes_accessed=a_bytes + n_cols * 16 * 2 + n_rows * (2 * 16 * 2 + 4)),
    )(a_bf, h2w3, skip03, skip13, b3s, wl_row, bl)

    return probs[:n]


# ----------------------------- glue (plain JAX) ------------------------------
def make_normalized_adj(adj, n):
    """A_hat = D^-1/2 (A + I) D^-1/2  (GCNConv normalization with self-loops)."""
    a = adj + jnp.eye(n, dtype=jnp.float32)
    deg = jnp.sum(a, axis=1)
    d_inv_sqrt = jnp.where(deg > 0, 1.0 / jnp.sqrt(deg), 0.0)
    return a * d_inv_sqrt[:, None] * d_inv_sqrt[None, :]


def init_linear(key, fan_in, fan_out):
    """PyTorch-style uniform(-1/sqrt(fan_in), 1/sqrt(fan_in)); W stored [in, out]."""
    kw, kb = jax.random.split(key)
    bound = 1.0 / jnp.sqrt(jnp.float32(fan_in))
    w = jax.random.uniform(kw, (fan_in, fan_out), jnp.float32, -bound, bound)
    b = jax.random.uniform(kb, (1, fan_out), jnp.float32, -bound, bound)
    return w, b


def init_params(key, num_features):
    keys = jax.random.split(key, 7)
    p = {}
    p["w1"], p["b1"] = init_linear(keys[0], num_features, 64)      # conv1
    p["ws02"], p["bs02"] = init_linear(keys[1], num_features, 32)  # skip0_2
    p["w2"], p["b2"] = init_linear(keys[2], 64, 32)                # conv2
    p["ws03"], p["bs03"] = init_linear(keys[3], num_features, 16)  # skip0_3
    p["ws13"], p["bs13"] = init_linear(keys[4], 64, 16)            # skip1_3
    p["w3"], p["b3"] = init_linear(keys[5], 32, 16)                # conv3
    p["wl"], p["bl"] = init_linear(keys[6], 16, 1)                 # linear
    return p


def reference_forward(a_hat, x, p):
    """Pure-JAX f32 reference of the same math for verification."""
    h1 = jnp.maximum(a_hat @ (x @ p["w1"]) + p["b1"], 0.0)
    h2 = jnp.maximum(a_hat @ (h1 @ p["w2"]) + p["b2"] + x @ p["ws02"] + p["bs02"], 0.0)
    h3 = jnp.maximum(
        a_hat @ (h2 @ p["w3"]) + p["b3"]
        + x @ p["ws03"] + p["bs03"]
        + h1 @ p["ws13"] + p["bs13"], 0.0)
    return jax.nn.sigmoid(h3 @ p["wl"] + p["bl"])


if __name__ == "__main__":
    key = jax.random.PRNGKey(0)
    k_x, k_adj, k_params = jax.random.split(key, 3)

    num_nodes = 32
    num_features = 16

    # Node features (data.x)
    x = jax.random.normal(k_x, (num_nodes, num_features), jnp.float32)

    # Random undirected graph -> dense adjacency (stands in for data.edge_index)
    upper = (jax.random.uniform(k_adj, (num_nodes, num_nodes)) < 0.15).astype(jnp.float32)
    upper = jnp.triu(upper, k=1)
    adj = upper + upper.T
    a_hat = make_normalized_adj(adj, num_nodes)

    params = init_params(k_params, num_features)
    ref = reference_forward(a_hat, x, params)

    # Fused small-graph path (default dispatch: A is read from HBM exactly once).
    fwd_fused = jax.jit(dense_gcn3_forward)
    out_fused = jax.block_until_ready(fwd_fused(a_hat, x, params))
    assert out_fused.shape == (num_nodes, 1)
    assert jnp.allclose(out_fused, ref, atol=3e-2), "fused path mismatch vs f32 reference"

    # Row-tiled multi-call path (exercised here by disabling the fused dispatch).
    fwd_tiled = jax.jit(lambda a, xx, p: dense_gcn3_forward(a, xx, p, fused_max_bytes=0))
    out_tiled = jax.block_until_ready(fwd_tiled(a_hat, x, params))
    assert out_tiled.shape == (num_nodes, 1)
    assert jnp.allclose(out_tiled, ref, atol=3e-2), "tiled path mismatch vs f32 reference"

    print("KERNEL_OK")
</pallas_src>

<mosaic_0001>
module attributes {stable_mosaic.version = 11 : i64} {
  func.func @_fused_small_kernel(%arg0: memref<32x32xbf16, #tpu.memory_space<vmem>>, %arg1: memref<32x16xbf16, #tpu.memory_space<vmem>>, %arg2: memref<16x64xbf16, #tpu.memory_space<vmem>>, %arg3: memref<1x64xf32, #tpu.memory_space<vmem>>, %arg4: memref<16x32xbf16, #tpu.memory_space<vmem>>, %arg5: memref<16x16xbf16, #tpu.memory_space<vmem>>, %arg6: memref<64x32xbf16, #tpu.memory_space<vmem>>, %arg7: memref<1x32xf32, #tpu.memory_space<vmem>>, %arg8: memref<64x16xbf16, #tpu.memory_space<vmem>>, %arg9: memref<32x16xbf16, #tpu.memory_space<vmem>>, %arg10: memref<1x16xf32, #tpu.memory_space<vmem>>, %arg11: memref<1x16xf32, #tpu.memory_space<vmem>>, %arg12: memref<1x1xf32, #tpu.memory_space<vmem>>, %arg13: memref<32x1xf32, #tpu.memory_space<vmem>>) attributes {dimension_semantics = [], scalar_prefetch = 0 : i64, scratch_operands = 0 : i64, tpu.core_type = #tpu.core_type<tc>} {
    %c0 = arith.constant 0 : index
    %c0_0 = arith.constant 0 : index
    %0 = vector.load %arg0[%c0, %c0_0] : memref<32x32xbf16, #tpu.memory_space<vmem>>, vector<32x32xbf16>
    %c0_1 = arith.constant 0 : index
    %c0_2 = arith.constant 0 : index
    %1 = vector.load %arg1[%c0_1, %c0_2] : memref<32x16xbf16, #tpu.memory_space<vmem>>, vector<32x16xbf16>
    %c0_3 = arith.constant 0 : index
    %c0_4 = arith.constant 0 : index
    %2 = vector.load %arg2[%c0_3, %c0_4] : memref<16x64xbf16, #tpu.memory_space<vmem>>, vector<16x64xbf16>
    %cst = arith.constant dense<0.000000e+00> : vector<32x64xf32>
    %3 = tpu.matmul %1, %2, %cst {dimension_numbers = #tpu.dot_dimension_numbers<[1], [0], [0], [1], [0, 0, 1, 1], [], []>} : vector<32x16xbf16>, vector<16x64xbf16>, vector<32x64xf32> -> vector<32x64xf32>
    %4 = arith.truncf %3 : vector<32x64xf32> to vector<32x64xbf16>
    %cst_5 = arith.constant dense<0.000000e+00> : vector<32x64xf32>
    %5 = tpu.matmul %0, %4, %cst_5 {dimension_numbers = #tpu.dot_dimension_numbers<[1], [0], [0], [1], [0, 0, 1, 1], [], []>} : vector<32x32xbf16>, vector<32x64xbf16>, vector<32x64xf32> -> vector<32x64xf32>
    %c0_6 = arith.constant 0 : index
    %c0_7 = arith.constant 0 : index
    %6 = vector.load %arg3[%c0_6, %c0_7] : memref<1x64xf32, #tpu.memory_space<vmem>>, vector<1x64xf32>
    %7 = vector.broadcast %6 : vector<1x64xf32> to vector<32x64xf32>
    %8 = arith.addf %5, %7 : vector<32x64xf32>
    %cst_8 = arith.constant 0.000000e+00 : f32
    %9 = vector.broadcast %cst_8 : f32 to vector<32x64xf32>
    %10 = arith.maximumf %8, %9 : vector<32x64xf32>
    %11 = arith.truncf %10 : vector<32x64xf32> to vector<32x64xbf16>
    %c0_9 = arith.constant 0 : index
    %c0_10 = arith.constant 0 : index
    %12 = vector.load %arg6[%c0_9, %c0_10] : memref<64x32xbf16, #tpu.memory_space<vmem>>, vector<64x32xbf16>
    %cst_11 = arith.constant dense<0.000000e+00> : vector<32x32xf32>
    %13 = tpu.matmul %11, %12, %cst_11 {dimension_numbers = #tpu.dot_dimension_numbers<[1], [0], [0], [1], [0, 0, 1, 1], [], []>} : vector<32x64xbf16>, vector<64x32xbf16>, vector<32x32xf32> -> vector<32x32xf32>
    %c0_12 = arith.constant 0 : index
    %c0_13 = arith.constant 0 : index
    %14 = vector.load %arg4[%c0_12, %c0_13] : memref<16x32xbf16, #tpu.memory_space<vmem>>, vector<16x32xbf16>
    %cst_14 = arith.constant dense<0.000000e+00> : vector<32x32xf32>
    %15 = tpu.matmul %1, %14, %cst_14 {dimension_numbers = #tpu.dot_dimension_numbers<[1], [0], [0], [1], [0, 0, 1, 1], [], []>} : vector<32x16xbf16>, vector<16x32xbf16>, vector<32x32xf32> -> vector<32x32xf32>
    %16 = arith.truncf %13 : vector<32x32xf32> to vector<32x32xbf16>
    %cst_15 = arith.constant dense<0.000000e+00> : vector<32x32xf32>
    %17 = tpu.matmul %0, %16, %cst_15 {dimension_numbers = #tpu.dot_dimension_numbers<[1], [0], [0], [1], [0, 0, 1, 1], [], []>} : vector<32x32xbf16>, vector<32x32xbf16>, vector<32x32xf32> -> vector<32x32xf32>
    %18 = arith.addf %17, %15 : vector<32x32xf32>
    %c0_16 = arith.constant 0 : index
    %c0_17 = arith.constant 0 : index
    %19 = vector.load %arg7[%c0_16, %c0_17] : memref<1x32xf32, #tpu.memory_space<vmem>>, vector<1x32xf32>
    %20 = vector.broadcast %19 : vector<1x32xf32> to vector<32x32xf32>
    %21 = arith.addf %18, %20 : vector<32x32xf32>
    %cst_18 = arith.constant 0.000000e+00 : f32
    %22 = vector.broadcast %cst_18 : f32 to vector<32x32xf32>
    %23 = arith.maximumf %21, %22 : vector<32x32xf32>
    %24 = arith.truncf %23 : vector<32x32xf32> to vector<32x32xbf16>
    %c0_19 = arith.constant 0 : index
    %c0_20 = arith.constant 0 : index
    %25 = vector.load %arg9[%c0_19, %c0_20] : memref<32x16xbf16, #tpu.memory_space<vmem>>, vector<32x16xbf16>
    %cst_21 = arith.constant dense<0.000000e+00> : vector<32x16xf32>
    %26 = tpu.matmul %24, %25, %cst_21 {dimension_numbers = #tpu.dot_dimension_numbers<[1], [0], [0], [1], [0, 0, 1, 1], [], []>} : vector<32x32xbf16>, vector<32x16xbf16>, vector<32x16xf32> -> vector<32x16xf32>
    %c0_22 = arith.constant 0 : index
    %c0_23 = arith.constant 0 : index
    %27 = vector.load %arg5[%c0_22, %c0_23] : memref<16x16xbf16, #tpu.memory_space<vmem>>, vector<16x16xbf16>
    %cst_24 = arith.constant dense<0.000000e+00> : vector<32x16xf32>
    %28 = tpu.matmul %1, %27, %cst_24 {dimension_numbers = #tpu.dot_dimension_numbers<[1], [0], [0], [1], [0, 0, 1, 1], [], []>} : vector<32x16xbf16>, vector<16x16xbf16>, vector<32x16xf32> -> vector<32x16xf32>
    %c0_25 = arith.constant 0 : index
    %c0_26 = arith.constant 0 : index
    %29 = vector.load %arg8[%c0_25, %c0_26] : memref<64x16xbf16, #tpu.memory_space<vmem>>, vector<64x16xbf16>
    %cst_27 = arith.constant dense<0.000000e+00> : vector<32x16xf32>
    %30 = tpu.matmul %11, %29, %cst_27 {dimension_numbers = #tpu.dot_dimension_numbers<[1], [0], [0], [1], [0, 0, 1, 1], [], []>} : vector<32x64xbf16>, vector<64x16xbf16>, vector<32x16xf32> -> vector<32x16xf32>
    %31 = arith.truncf %26 : vector<32x16xf32> to vector<32x16xbf16>
    %cst_28 = arith.constant dense<0.000000e+00> : vector<32x16xf32>
    %32 = tpu.matmul %0, %31, %cst_28 {dimension_numbers = #tpu.dot_dimension_numbers<[1], [0], [0], [1], [0, 0, 1, 1], [], []>} : vector<32x32xbf16>, vector<32x16xbf16>, vector<32x16xf32> -> vector<32x16xf32>
    %33 = arith.addf %32, %28 : vector<32x16xf32>
    %34 = arith.addf %33, %30 : vector<32x16xf32>
    %c0_29 = arith.constant 0 : index
    %c0_30 = arith.constant 0 : index
    %35 = vector.load %arg10[%c0_29, %c0_30] : memref<1x16xf32, #tpu.memory_space<vmem>>, vector<1x16xf32>
    %36 = vector.broadcast %35 : vector<1x16xf32> to vector<32x16xf32>
    %37 = arith.addf %34, %36 : vector<32x16xf32>
    %cst_31 = arith.constant 0.000000e+00 : f32
    %38 = vector.broadcast %cst_31 : f32 to vector<32x16xf32>
    %39 = arith.maximumf %37, %38 : vector<32x16xf32>
    %c0_32 = arith.constant 0 : index
    %c0_33 = arith.constant 0 : index
    %40 = vector.load %arg11[%c0_32, %c0_33] : memref<1x16xf32, #tpu.memory_space<vmem>>, vector<1x16xf32>
    %41 = vector.broadcast %40 : vector<1x16xf32> to vector<32x16xf32>
    %42 = arith.mulf %39, %41 : vector<32x16xf32>
    %cst_34 = arith.constant dense<0.000000e+00> : vector<32xf32>
    %43 = vector.multi_reduction <add>, %42, %cst_34 [1] : vector<32x16xf32> to vector<32xf32>
    %44 = vector.shape_cast %43 : vector<32xf32> to vector<32x1xf32>
    %c0_35 = arith.constant 0 : index
    %c0_36 = arith.constant 0 : index
    %45 = vector.load %arg12[%c0_35, %c0_36] : memref<1x1xf32, #tpu.memory_space<vmem>>, vector<1x1xf32>
    %46 = vector.broadcast %45 : vector<1x1xf32> to vector<32x1xf32>
    %47 = arith.addf %44, %46 : vector<32x1xf32>
    %48 = arith.negf %47 : vector<32x1xf32>
    %49 = math.exp %48 : vector<32x1xf32>
    %cst_37 = arith.constant 1.000000e+00 : f32
    %50 = vector.broadcast %cst_37 : f32 to vector<32x1xf32>
    %51 = arith.addf %50, %49 : vector<32x1xf32>
    %52 = arith.divf %50, %51 : vector<32x1xf32>
    %c0_38 = arith.constant 0 : index
    %c0_39 = arith.constant 0 : index
    %53 = vector.load %arg13[%c0_38, %c0_39] : memref<32x1xf32, #tpu.memory_space<vmem>>, vector<32x1xf32>
    tpu.vector_store %arg13[%c0_38, %c0_39], %52 {strides = array<i32>} : memref<32x1xf32, #tpu.memory_space<vmem>>, vector<32x1xf32>,
    return
  }
}

</mosaic_0001>

<bundles_post_ra>
// kernel: dense_gcn3_forward.1
= control target key start
LH: loop header
LB: loop body
LE: loop exit
PB: predicated region body
PF: predicated region fallthrough
CT: control target
= control target key end

     0   :  { %vm73_vm0 = vcmask 130048   ;;  %vm148_vm1 = vcmask 261120   ;;  %vm242_vm2 = vcmask 523264   ;;  %vm760_vm3 = vcmask 7168   ;;  %s1159_s2 = inlined_call_operand.vmem [shape: bf16[16,64], index: 2, kind: input, shape index: {}]   ;;  %s1160_s1 = inlined_call_operand.vmem [shape: bf16[32,16], index: 1, kind: input, shape index: {}]   ;;  %s1161_s0 = inlined_call_operand.vmem [shape: bf16[32,32], index: 0, kind: input, shape index: {}]   ;;  %s1162_s6 = inlined_call_operand.vmem [shape: bf16[64,32], index: 6, kind: input, shape index: {}]   ;;  %s1163_s4 = inlined_call_operand.vmem [shape: bf16[16,32], index: 4, kind: input, shape index: {}]   ;;  %s1164_s3 = inlined_call_operand.vmem [shape: f32[1,64], index: 3, kind: input, shape index: {}]   ;;  %s1165_s5 = inlined_call_operand.vmem [shape: bf16[16,16], index: 5, kind: input, shape index: {}]   ;;  %s1166_s8 = inlined_call_operand.vmem [shape: bf16[64,16], index: 8, kind: input, shape index: {}]   ;;  %s1167_s9 = inlined_call_operand.vmem [shape: bf16[32,16], index: 9, kind: input, shape index: {}]   ;;  %s1168_s7 = inlined_call_operand.vmem [shape: f32[1,32], index: 7, kind: input, shape index: {}]   ;;  %s1169_s12 = inlined_call_operand.<no memory space> [shape: f32[1,1], index: 12, kind: input, shape index: {}]   ;;  %s1170_s10 = inlined_call_operand.vmem [shape: f32[1,16], index: 10, kind: input, shape index: {}]   ;;  %s1171_s11 = inlined_call_operand.vmem [shape: f32[1,16], index: 11, kind: input, shape index: {}]   ;;  %s1172_s13 = inlined_call_operand.vmem [shape: f32[32,1], index: 13, kind: output, shape index: {}]  }
   0x1   :  { %v936_v0 = vld [vmem:[%s1159_s2] sm:$0xff]   ;;  %v1050_v2 = vld [vmem:[%s1160_s1 + $0x8] sm:$0xff]   ;;  %v943_v13 = vld [vmem:[%s1162_s6 + $0x10] sm:$0xff]  }
   0x2   :  { %v1045_v1 = vld [vmem:[%s1160_s1] sm:$0xff]   ;;  %850 = vmatprep.subr.bf16.mxu0 %v936_v0  ;;  %v1071_v11 = vld [vmem:[%s1161_s0 + $0x8] sm:$0xff]   ;;  %v944_v14 = vld [vmem:[%s1162_s6 + $0x18] sm:$0xff]  }
   0x3   :  { %851 = vmatpush3.bf16.msra.mxu0 %v936_v0  ;;  %852 = vmatprep.mubr.msk.bf16.mxu0 %vm73_vm0, %v1045_v1  ;;  %v1061_v3 = vld [vmem:[%s1161_s0] sm:$0xff]   ;;  %v942_v12 = vld [vmem:[%s1162_s6 + $0x8] sm:$0xff]   ;;  %v949_v40 = vld [vmem:[%s1166_s8 + $0x10] sm:$0xff]  }
   0x4   :  { %878 = vmatprep.mubr.msk.bf16.mxu1 %vm73_vm0, %v1045_v1  ;;  %v941_v10 = vld [vmem:[%s1162_s6] sm:$0xff]   ;;  %v948_v39 = vld [vmem:[%s1166_s8 + $0x8] sm:$0xff]   ;;  %v950_v41 = vld [vmem:[%s1166_s8 + $0x18] sm:$0xff]  }
   0x5   :  { %v945_v15 = vld [vmem:[%s1163_s4] sm:$0xff]   ;;  %v952_v43 = vld [vmem:[%s1167_s9 + $0x8] sm:$0xff]  }
   0x6   :  { %853 = vmatmul.mubr.msk.bf16.vlgmr.msra.gmra.mrb[0].mxu0 %vm73_vm0, %v1050_v2  ;;  %876 = vmatprep.subr.bf16.mxu1 %v945_v15  ;;  %v774_v16 = vld [vmem:[%s1164_s3] ss:$0 sm:$0xff] }
   0x7   :  { %860 = vmatprep.mubr.msk.bf16.mxu0 %vm148_vm1, %v1061_v3  ;;  %877 = vmatpush3.bf16.msra.mxu1 %v945_v15  ;;  %v946_v37 = vld [vmem:[%s1165_s5] sm:$0xff]  }
   0x8   :  { %v947_v38 = vld [vmem:[%s1166_s8] sm:$0xff]  }
   0x9   :  { %v951_v42 = vld [vmem:[%s1167_s9] sm:$0xff]  }
   0xa   :  { %879 = vmatmul.mubr.msk.bf16.vlgmr.msra.gmra.mrb[0].mxu1 %vm73_vm0, %v1050_v2  ;;  %v790_v44 = vld [vmem:[%s1168_s7] ss:$0 sm:$0xff] }
   0xb   :  { %886 = vmatprep.mubr.msk.bf16.mxu1 %vm148_vm1, %v1061_v3 }
  0xd9   :  { %v854_v4 = vpop.f32.mrb[0].mxu0 }
  0xda   :  { %v114_v5 = vpop.f32.mrb[1].mxu0 }
  0xdb   :  { %v855_v6 = vpop.f32.mrb[2].mxu0 }
  0xdc   :  { %v130_v7 = vpack.c.bf16 %v855_v6, %v854_v4  ;;  %v117_v8 = vpop.f32.mrb[3].mxu0 }
  0xdd   :  { %v129_v9 = vpack.c.bf16 %v117_v8, %v114_v5  ;;  %v807_v8 = vld [vmem:[%s1171_s11] ss:$0 sm:$0xff] }
  0xdf   :  { %856 = vmatprep.subr.bf16.mxu0 %v129_v9 }
  0xe0   :  { %857 = vmatpush3.bf16.msra.mxu0 %v129_v9 }
  0xe1   :  { %858 = vmatprep.subr.bf16.mxu0 %v130_v7 }
  0xe4   :  { %859 = vmatpush3.bf16.msra.mxu0 %v130_v7 }
  0xe5   :  { %864 = vmatprep.subr.bf16.mxu0 %v941_v10 }
  0xe7   :  { %861 = vmatmul.mubr.msk.bf16.vlgmr.msra.gmra.mrb[4].mxu0 %vm148_vm1, %v1071_v11 }
  0xe8   :  { %865 = vmatpush3.bf16.msra.mxu0 %v941_v10 }
  0xe9   :  { %866 = vmatprep.subr.bf16.mxu0 %v942_v12 }
  0xec   :  { %867 = vmatpush3.bf16.msra.mxu0 %v942_v12 }
  0xed   :  { %868 = vmatprep.subr.bf16.mxu0 %v943_v13 }
  0xf0   :  { %869 = vmatpush3.bf16.msra.mxu0 %v943_v13 }
  0xf1   :  { %870 = vmatprep.subr.bf16.mxu0 %v944_v14 }
  0xf4   :  { %871 = vmatpush3.bf16.msra.mxu0 %v944_v14 }
  0xf5   :  { %890 = vmatprep.subr.bf16.mxu0 %v951_v42 }
 0x1ba   :  { %v862_v17 = vpop.f32.mrb[4].mxu0 }
 0x1bb   :  { %v198_v18 = vadd.f32 %v862_v17, %v774_v16  ;;  %v189_v19 = vpop.f32.mrb[5].mxu0 }
 0x1bc   :  { %v190_v20 = vadd.f32 %v774_v16, %v189_v19  ;;  %v863_v21 = vpop.f32.mrb[6].mxu0 }
 0x1bd   :  { %v201_v22 = vadd.f32 %v863_v21, %v774_v16  ;;  %v192_v23 = vpop.f32.mrb[7].mxu0  ;;  %v206_v25 = vmax.f32 %v198_v18, 0.0 }
 0x1be   :  { %v193_v24 = vadd.f32 %v774_v16, %v192_v23  ;;  %v204_v27 = vmax.f32 %v190_v20, 0.0 }
 0x1bf   :  { %v207_v26 = vmax.f32 %v201_v22, 0.0 }
 0x1c0   :  { %v205_v28 = vmax.f32 %v193_v24, 0.0 }
 0x1c1   :  { %v209_v29 = vpack.c.bf16 %v207_v26, %v206_v25 }
 0x1c2   :  { %v208_v30 = vpack.c.bf16 %v205_v28, %v204_v27 }
 0x1c4   :  { %872 = vmatprep.mubr.msk.bf16.mxu0 %vm242_vm2, %v208_v30 }
 0x1c5   :  { %873 = vmatmul.mubr.msk.bf16.vlgmr.msra.gmra.mrb[8].mxu0 %vm242_vm2, %v209_v29 }
 0x1c6   :  { %891 = vmatpush3.bf16.msra.mxu0 %v951_v42 }
 0x1c7   :  { %892 = vmatprep.subr.bf16.mxu0 %v952_v43 }
 0x1ca   :  { %893 = vmatpush3.bf16.msra.mxu0 %v952_v43 }
 0x298   :  { %v874_v31 = vpop.f32.mrb[8].mxu0 }
 0x299   :  { %v283_v32 = vpop.f32.mrb[9].mxu0 }
 0x29a   :  { %v875_v33 = vpop.f32.mrb[10].mxu0 }
 0x29b   :  { %v356_v34 = vpack.c.bf16 %v875_v33, %v874_v31  ;;  %v286_v35 = vpop.f32.mrb[11].mxu0 }
 0x29c   :  { %v355_v36 = vpack.c.bf16 %v286_v35, %v283_v32 }
 0x29e   :  { %882 = vmatprep.subr.bf16.mxu1 %v355_v36 }
 0x29f   :  { %883 = vmatpush3.bf16.msra.mxu1 %v355_v36 }
 0x2a0   :  { %884 = vmatprep.subr.bf16.mxu1 %v356_v34 }
 0x2a3   :  { %885 = vmatpush3.bf16.msra.mxu1 %v356_v34 }
 0x2a4   :  { %898 = vmatprep.subr.bf16.mxu1 %v946_v37 }
 0x2a6   :  { %887 = vmatmul.mubr.msk.bf16.vlgmr.msra.gmra.mrb[0].mxu1 %vm148_vm1, %v1071_v11 }
 0x2a7   :  { %899 = vmatpush3.bf16.msra.mxu1 %v946_v37  ;;  %900 = vmatprep.mubr.msk.bf16.mxu1 %vm73_vm0, %v1045_v1  ;;  %v18_v1 = vstv %s1169_s12 }
 0x2a8   :  { %904 = vmatprep.subr.bf16.mxu1 %v947_v38  ;;  %19 = vst [vmem:[#allocation2] sm:$0x1] %v18_v1 }
 0x2ae   :  { %901 = vmatmul.mubr.msk.bf16.vlgmr.msra.gmra.mrb[4].mxu1 %vm73_vm0, %v1050_v2  ;;  %v806_v2 = vld [vmem:[%s1170_s10] ss:$0 sm:$0xff] }
 0x2af   :  { %905 = vmatpush3.bf16.msra.mxu1 %v947_v38  ;;  %912 = vmatprep.mubr.msk.bf16.mxu1 %vm242_vm2, %v208_v30  ;;  %v808_v24 = vld [vmem:[#allocation2] ss:$0 sm:$0xff] }
 0x2b0   :  { %906 = vmatprep.subr.bf16.mxu1 %v948_v39 }
 0x2b3   :  { %907 = vmatpush3.bf16.msra.mxu1 %v948_v39 }
 0x2b4   :  { %908 = vmatprep.subr.bf16.mxu1 %v949_v40 }
 0x2b7   :  { %909 = vmatpush3.bf16.msra.mxu1 %v949_v40 }
 0x2b8   :  { %910 = vmatprep.subr.bf16.mxu1 %v950_v41 }
 0x2bb   :  { %911 = vmatpush3.bf16.msra.mxu1 %v950_v41 }
 0x2be   :  { %913 = vmatmul.mubr.msk.bf16.vlgmr.msra.gmra.mrb[4].mxu1 %vm242_vm2, %v209_v29 }
 0x2bf   :  { %920 = vmatprep.mubr.msk.bf16.mxu1 %vm148_vm1, %v1061_v3 }
 0x379   :  { %v888_v45 = vpop.f32.mrb[0].mxu1 }
 0x37a   :  { %v415_v46 = vadd.f32 %v888_v45, %v790_v44  ;;  %v391_v47 = vpop.f32.mrb[1].mxu1 }
 0x37b   :  { %v413_v48 = vadd.f32 %v790_v44, %v391_v47  ;;  %v889_v49 = vpop.f32.mrb[2].mxu1 }
 0x37c   :  { %v416_v50 = vadd.f32 %v889_v49, %v790_v44  ;;  %v394_v51 = vpop.f32.mrb[3].mxu1  ;;  %v419_v53 = vmax.f32 %v415_v46, 0.0 }
 0x37d   :  { %v414_v52 = vadd.f32 %v790_v44, %v394_v51  ;;  %v417_v55 = vmax.f32 %v413_v48, 0.0 }
 0x37e   :  { %v420_v54 = vmax.f32 %v416_v50, 0.0 }
 0x37f   :  { %v418_v56 = vmax.f32 %v414_v52, 0.0 }
 0x380   :  { %v422_v57 = vpack.c.bf16 %v420_v54, %v419_v53 }
 0x381   :  { %v421_v58 = vpack.c.bf16 %v418_v56, %v417_v55 }
 0x383   :  { %894 = vmatprep.mubr.msk.bf16.mxu0 %vm148_vm1, %v421_v58 }
 0x384   :  { %895 = vmatmul.mubr.msk.bf16.vlgmr.msra.gmra.mrb[12].mxu0 %vm148_vm1, %v422_v57 }
 0x457   :  { %v896_v59 = vpop.f32.mrb[12].mxu0 }
 0x458   :  { %v479_v60 = vpop.f32.mrb[13].mxu0 }
 0x459   :  { %v897_v61 = vpop.f32.mrb[14].mxu0 }
 0x45a   :  { %v633_v62 = vpack.c.bf16 %v897_v61, %v896_v59  ;;  %v482_v63 = vpop.f32.mrb[15].mxu0 }
 0x45b   :  { %v632_v0 = vpack.c.bf16 %v482_v63, %v479_v60 }
 0x45d   :  { %916 = vmatprep.subr.bf16.mxu1 %v632_v0 }
 0x45e   :  { %917 = vmatpush3.bf16.msra.mxu1 %v632_v0 }
 0x45f   :  { %918 = vmatprep.subr.bf16.mxu1 %v633_v62 }
 0x462   :  { %919 = vmatpush3.bf16.msra.mxu1 %v633_v62 }
 0x465   :  { %921 = vmatmul.mubr.msk.bf16.vlgmr.msra.gmra.mrb[4].mxu1 %vm148_vm1, %v1071_v11 }
 0x538   :  { %v922_v3 = vpop.f32.mrb[4].mxu1 }
 0x539   :  { %v696_v4 = vadd.f32 %v922_v3, %v806_v2  ;;  %v668_v5 = vpop.f32.mrb[5].mxu1 }
 0x53a   :  { %v694_v6 = vadd.f32 %v806_v2, %v668_v5  ;;  %v923_v7 = vpop.f32.mrb[6].mxu1 }
 0x53b   :  { %v700_v9 = vmax.f32 %v696_v4, 0.0  ;;  %v697_v10 = vadd.f32 %v923_v7, %v806_v2  ;;  %v671_v11 = vpop.f32.mrb[7].mxu1 }
 0x53c   :  { %v698_v12 = vmax.f32 %v694_v6, 0.0  ;;  %v695_v13 = vadd.f32 %v806_v2, %v671_v11 }
 0x53d   :  { %v701_v14 = vmax.f32 %v697_v10, 0.0  ;;  %v711_v15 = vmul.f32 %v807_v8, %v700_v9 }
 0x53e   :  { %v699_v16 = vmax.f32 %v695_v13, 0.0  ;;  %v709_v17 = vmul.f32 %v807_v8, %v698_v12 }
 0x53f   :  { %v719_v18 = vsel %vm73_vm0, %v711_v15, 0.0  ;;  %v712_v19 = vmul.f32 %v807_v8, %v701_v14 }
 0x540   :  { %720 = vadd.xlane.f32.xlu1 %v719_v18  ;;  %v713_v20 = vsel %vm73_vm0, %v709_v17, 0.0  ;;  %v710_v21 = vmul.f32 %v807_v8, %v699_v16 }
 0x541   :  { %714 = vadd.xlane.f32.xlu0 %v713_v20  ;;  %v722_v22 = vsel %vm73_vm0, %v712_v19, 0.0 }
 0x542   :  { %v716_v23 = vsel %vm73_vm0, %v710_v21, 0.0 }
 0x544   :  { %723 = vadd.xlane.f32.xlu1 %v722_v22 }
 0x545   :  { %717 = vadd.xlane.f32.xlu0 %v716_v23 }
 0x5cd   :  { %v721_v25 = vpop.xlane.xlu1 %720 }
 0x5ce   :  { %v734_v26 = vadd.f32 %v808_v24, %v721_v25  ;;  %v715_v27 = vpop.xlane.xlu0 %714 }
 0x5cf   :  { %v732_v28 = vadd.f32 %v808_v24, %v715_v27 }
 0x5d0   :  { %v811_v29 = vmul.f32 -1.442695, %v734_v26 }
 0x5d1   :  { %v809_v30 = vmul.f32 -1.442695, %v732_v28  ;;  %v724_v31 = vpop.xlane.xlu1 %723 }
 0x5d2   :  { %953 = vpow2.f32 %v811_v29  ;;  %v735_v32 = vadd.f32 %v808_v24, %v724_v31  ;;  %v718_v33 = vpop.xlane.xlu0 %717 }
 0x5d3   :  { %955 = vpow2.f32 %v809_v30  ;;  %v733_v34 = vadd.f32 %v808_v24, %v718_v33 }
 0x5d4   :  { %v812_v35 = vmul.f32 -1.442695, %v735_v32 }
 0x5d5   :  { %v810_v36 = vmul.f32 -1.442695, %v733_v34 }
 0x5d6   :  { %957 = vpow2.f32 %v812_v35 }
 0x5d7   :  { %959 = vpow2.f32 %v810_v36 }
 0x5dc   :  { %v954_v37 = vpop.eup %953 }
 0x5dd   :  { %v956_v38 = vpop.eup %955  ;;  %v750_v39 = vadd.f32 1.0, %v954_v37 }
 0x5de   :  { %v748_v40 = vadd.f32 1.0, %v956_v38 }
 0x5df   :  { %961 = vrcp.f32 %v750_v39 }
 0x5e0   :  { %v958_v41 = vpop.eup %957  ;;  %963 = vrcp.f32 %v748_v40 }
 0x5e1   :  { %v960_v42 = vpop.eup %959  ;;  %v751_v43 = vadd.f32 1.0, %v958_v41 }
 0x5e2   :  { %v749_v44 = vadd.f32 1.0, %v960_v42 }
 0x5e3   :  { %965 = vrcp.f32 %v751_v43 }
 0x5e4   :  { %967 = vrcp.f32 %v749_v44 }
 0x5e9   :  { %v962_v45 = vpop.eup %961 }
 0x5ea   :  { %v964_v46 = vpop.eup %963  ;;  %763 = vst.msk [vmem:[%s1172_s13 + $0x10] sm:$0xff] %vm760_vm3, %v962_v45 }
 0x5eb   :  { %761 = vst.msk [vmem:[%s1172_s13] sm:$0xff] %vm760_vm3, %v964_v46 }
 0x5ed   :  { %v966_v47 = vpop.eup %965 }
 0x5ee   :  { %v968_v48 = vpop.eup %967  ;;  %764 = vst.msk [vmem:[%s1172_s13 + $0x18] sm:$0xff] %vm760_vm3, %v966_v47 }
 0x5ef   :  { %762 = vst.msk [vmem:[%s1172_s13 + $0x8] sm:$0xff] %vm760_vm3, %v968_v48 }

</bundles_post_ra>
